<compile_context>
chip_gen: v6e
topology: v6e:2x2x1
jax: 0.10.0
libtpu: 0.0.40
codegen_flags: <defaults>
</compile_context>

<pallas_src>
import numpy as np
import jax
import jax.numpy as jnp
from jax.experimental import pallas as pl
from jax.experimental.pallas import tpu as pltpu

_PH = jax.lax.Precision.HIGHEST  # wrapper-side (tiny) matmuls in full f32


def _round_up(x, m):
    return ((x + m - 1) // m) * m


# ----------------------------------------------------------------------------
# The single fused Pallas kernel
# ----------------------------------------------------------------------------

def _inception_kernel(x_ref, w_ref, b_ref, g_ref, bt_ref, fcw_ref, fcb_ref, o_ref):
    """conv(all 4 branches) + bias + BatchNorm(batch stats) + ReLU + folded FC.

    x_ref  : (M, Kp)   im2col patches, M = N*H*W rows in (n, h, w) order,
                       Kp = 128 (zero-padded contraction dim).
    w_ref  : (Kp, Cp)  block-structured conv weight, Cp = 128, cols [a|b|c|d|0..].
    b_ref, g_ref, bt_ref : (1, Cp)  conv bias / BN gamma / BN beta (zero-padded).
    fcw_ref: (R, M)    block-diagonal folded FC weight, R = N*H*Kc rows in
                       (n, h, class) order; block g=(n,h) holds w_fc^T.
    fcb_ref: (R, 1)    folded FC bias per output row.
    o_ref  : (R, Cp)   rows = (n, h, class), lanes = concat channel (lane-dense).
    """
    # All four conv branches in one MXU pass (+ conv bias).
    acc = jnp.dot(x_ref[...], w_ref[...], preferred_element_type=jnp.float32)
    acc = acc + b_ref[...]
    # BatchNorm2d, training-mode batch statistics over all N*H*W rows
    # (biased variance, eps=1e-5), then affine + ReLU.  Padded channels have
    # zero weight/bias/gamma/beta, so they stay exactly 0 through this.
    mean = jnp.mean(acc, axis=0, keepdims=True)
    var = jnp.mean(jnp.square(acc - mean), axis=0, keepdims=True)
    y = (acc - mean) * jax.lax.rsqrt(var + 1e-5)
    y = jnp.maximum(y * g_ref[...] + bt_ref[...], 0.0)
    # Folded Linear(720->1024)->Linear(1024->n_classes): the W spatial axis is a
    # row-index component of y, so contracting it through a block-diagonal
    # weight keeps this a plain 2-D matmul (no in-kernel transpose needed).
    out = jnp.dot(fcw_ref[...], y, preferred_element_type=jnp.float32)
    o_ref[...] = out + fcb_ref[...]


# ----------------------------------------------------------------------------
# Wrappers / glue (padding, im2col, weight assembly, reshapes)
# ----------------------------------------------------------------------------

def _im2col(x_nhwc, K, pad):
    N, H, W, C = x_nhwc.shape
    xp = jnp.pad(x_nhwc, ((0, 0), (pad, pad), (pad, pad), (0, 0)))
    cols = [xp[:, dy:dy + H, dx:dx + W, :] for dy in range(K) for dx in range(K)]
    col = jnp.concatenate(cols, axis=-1)              # (N, H, W, K*K*C)
    return col.reshape(N * H * W, K * K * C)          # rows in (n, h, w) order


def _assemble_fused_conv_weight(wa, wb, wc, wd, cin):
    """Block-structured weight so ONE matmul computes all four conv branches.

    Rows 0..25*cin-1   : 5x5 window taps of x (pad=2), (dy,dx,ci) order.
    Rows 25*cin..+9*cin: 3x3 window taps of the avg-pooled x (pad=1).
    Columns [0:10|10:20|20:30|30:40] = branches a(1x1) | b(3x3) | c(5x5) | d(pool).
    """
    co = wa.shape[-1]
    # branch a: 1x1 conv == centre tap of the 5x5 window, (dy, dx) = (2, 2)
    w5_a = jnp.zeros((25 * cin, co), jnp.float32).at[12 * cin:13 * cin].set(
        wa.reshape(cin, co))
    # branch b: 3x3 conv (pad=1) == inner 3x3 taps, (dy, dx) = (kh+1, kw+1)
    rows_b = np.asarray([((kh + 1) * 5 + (kw + 1)) * cin + ci
                         for kh in range(3) for kw in range(3)
                         for ci in range(cin)], dtype=np.int32)
    w5_b = jnp.zeros((25 * cin, co), jnp.float32).at[jnp.asarray(rows_b)].set(
        wb.reshape(9 * cin, co))
    # branch c: 5x5 conv (pad=2) == all 25 taps
    w5_c = wc.reshape(25 * cin, co)
    top = jnp.concatenate(
        [w5_a, w5_b, w5_c, jnp.zeros((25 * cin, co), jnp.float32)], axis=1)
    # branch d: 3x3 conv (pad=1) on the avg-pooled input
    bot = jnp.concatenate(
        [jnp.zeros((9 * cin, 3 * co), jnp.float32), wd.reshape(9 * cin, co)], axis=1)
    return jnp.concatenate([top, bot], axis=0)        # (34*cin, 4*co) = (102, 40)


def _adaptive_max_indices(in_size, out_size):
    """PyTorch adaptive-pool bin starts, requiring single-element bins
    (always true when in_size <= out_size) so max == plain index replication."""
    i = np.arange(out_size, dtype=np.int64)
    starts = (i * in_size) // out_size
    ends = -(-((i + 1) * in_size) // out_size)        # ceil
    # TODO(synk): general multi-element AdaptiveMaxPool2d bins (in_size > out_size)
    # are not reachable for this module (8x8 -> 720x720) and are not implemented.
    assert np.all(ends - starts == 1), "AdaptiveMaxPool2d bins are not single-element"
    return starts.astype(np.int32)


# ----------------------------------------------------------------------------
# Full Inception forward (single fused Pallas kernel)
# ----------------------------------------------------------------------------

def inception_forward(x_nchw, params, out_hw=720):
    x = jnp.transpose(x_nchw, (0, 2, 3, 1)).astype(jnp.float32)   # NCHW -> NHWC
    N, H, W, Cin = x.shape
    M = N * H * W

    # --- patch preparation (exact XLA glue feeding the fused kernel) ---------
    # F.avg_pool2d(x, 3, 1, 1) with count_include_pad=True (divide by 9).
    pooled = jax.lax.reduce_window(
        x, 0.0, jax.lax.add, (1, 3, 3, 1), (1, 1, 1, 1),
        [(0, 0), (1, 1), (1, 1), (0, 0)]) * (1.0 / 9.0)
    patches = jnp.concatenate([_im2col(x, 5, 2), _im2col(pooled, 3, 1)], axis=1)
    Kdim = patches.shape[1]                           # 34*Cin = 102
    Kp = _round_up(Kdim, 128)
    patches = jnp.pad(patches, ((0, 0), (0, Kp - Kdim)))          # (M, 128)

    # --- block-structured conv weight + BN params, channel dim padded to 128 -
    wa, ba, ga, bta = params["conv1"]
    wb, bb, gb, btb = params["conv2"]
    wc, bc, gc, btc = params["conv3"]
    wd, bd, gd, btd = params["pool"]
    w_blk = _assemble_fused_conv_weight(wa, wb, wc, wd, Cin)      # (102, 40)
    Cout = w_blk.shape[1]
    Cp = _round_up(Cout, 128)
    w_blk = jnp.pad(w_blk, ((0, Kp - Kdim), (0, Cp - Cout)))      # (128, 128)
    pad_c = ((0, 0), (0, Cp - Cout))
    b_blk = jnp.pad(jnp.concatenate([ba, bb, bc, bd], axis=1), pad_c)
    g_blk = jnp.pad(jnp.concatenate([ga, gb, gc, gd], axis=1), pad_c)   # gamma=0 pad
    bt_blk = jnp.pad(jnp.concatenate([bta, btb, btc, btd], axis=1), pad_c)  # beta=0 pad

    # --- AdaptiveMaxPool2d(out_hw) on HxW: single-element bins == replication -
    hidx = _adaptive_max_indices(H, out_hw)
    widx = _adaptive_max_indices(W, out_hw)
    rep_h, rep_w = out_hw // H, out_hw // W
    assert out_hw % H == 0 and np.array_equal(hidx, np.repeat(np.arange(H), rep_h))
    assert out_hw % W == 0 and np.array_equal(widx, np.repeat(np.arange(W), rep_w))

    # --- fold Linear(720->1024) -> Linear(1024->n_classes) -------------------
    w1, b1 = params["linear"]
    w2, b2 = params["fc"]
    n_classes = w2.shape[1]
    # Fold the W-axis replication into w1: sum its rows per unique source column.
    w1_binned = jnp.sum(w1.reshape(W, rep_w, -1), axis=1)         # (W, 1024)
    # Fold the two Linears (no nonlinearity in between).
    w_f = jnp.dot(w1_binned, w2, precision=_PH)                   # (W, n_classes)
    b_f = jnp.dot(b1, w2, precision=_PH) + b2                     # (1, n_classes)
    Kc = _round_up(n_classes, 8)                                  # class rows, pad to 8
    w_fp = jnp.pad(w_f, ((0, 0), (0, Kc - n_classes)))            # (W, Kc)
    b_fp = jnp.pad(b_f, ((0, 0), (0, Kc - n_classes)))            # (1, Kc)
    # Block-diagonal FC weight: one (Kc, W) block per (n, h) group so the
    # contraction over W is a plain 2-D matmul against y's (n, h, w) rows.
    NH = N * H
    fc_w = jnp.kron(jnp.eye(NH, dtype=jnp.float32), w_fp.T)       # (NH*Kc, M)
    fc_b = jnp.tile(b_fp.T, (NH, 1))                              # (NH*Kc, 1)
    R = NH * Kc

    # --- the single fused Pallas kernel --------------------------------------
    out = pl.pallas_call(
        _inception_kernel,
        out_shape=jax.ShapeDtypeStruct((R, Cp), jnp.float32),
        in_specs=[pl.BlockSpec(memory_space=pltpu.MemorySpace.VMEM)] * 7,
        out_specs=pl.BlockSpec(memory_space=pltpu.MemorySpace.VMEM),
    )(patches, w_blk, b_blk, g_blk, bt_blk, fc_w, fc_b)

    # --- un-pad + replicate the H axis via broadcast (no 720-row gather) -----
    out = out.reshape(N, H, Kc, Cp)[:, :, :n_classes, :Cout]      # (N, H, nc, 40)
    out = jnp.transpose(out, (0, 3, 1, 2))                        # (N, 40, H, nc)  tiny
    out = jnp.broadcast_to(out[:, :, :, None, :], (N, Cout, H, rep_h, n_classes))
    return out.reshape(N, Cout, H * rep_h, n_classes)             # (N, 40, 720, nc)


# ----------------------------------------------------------------------------
# Plain-JAX reference (validates the algebraic rewrites, no Pallas)
# ----------------------------------------------------------------------------

def _ref_block(x, w, b, g, bt, pad):
    y = jax.lax.conv_general_dilated(
        x, w, window_strides=(1, 1), padding=[(pad, pad), (pad, pad)],
        dimension_numbers=("NHWC", "HWIO", "NHWC"), precision=_PH)
    y = y + b.reshape(1, 1, 1, -1)
    m = jnp.mean(y, axis=(0, 1, 2), keepdims=True)
    v = jnp.mean(jnp.square(y - m), axis=(0, 1, 2), keepdims=True)
    y = (y - m) * jax.lax.rsqrt(v + 1e-5) * g.reshape(1, 1, 1, -1) + bt.reshape(1, 1, 1, -1)
    return jnp.maximum(y, 0.0)


def reference_forward(x_nchw, params, out_hw=720):
    x = jnp.transpose(x_nchw, (0, 2, 3, 1)).astype(jnp.float32)
    N, H, W, _ = x.shape
    a = _ref_block(x, *params["conv1"], pad=0)
    b = _ref_block(x, *params["conv2"], pad=1)
    c = _ref_block(x, *params["conv3"], pad=2)
    pooled = jax.lax.reduce_window(
        x, 0.0, jax.lax.add, (1, 3, 3, 1), (1, 1, 1, 1),
        [(0, 0), (1, 1), (1, 1), (0, 0)]) / 9.0
    d = _ref_block(pooled, *params["pool"], pad=1)
    res = jnp.concatenate([a, b, c, d], axis=-1)
    res_nchw = jnp.transpose(res, (0, 3, 1, 2))
    C = res_nchw.shape[1]
    hidx = _adaptive_max_indices(H, out_hw)
    widx = _adaptive_max_indices(W, out_hw)
    # Full-width (720) features and unfused Linears — checks binning + folding.
    change_rows = jnp.take(res_nchw.reshape(N * C * H, W), jnp.asarray(widx), axis=1)
    w1, b1 = params["linear"]
    w2, b2 = params["fc"]
    u = jnp.dot(jnp.dot(change_rows, w1, precision=_PH) + b1, w2, precision=_PH) + b2
    u = u.reshape(N, C, H, -1)
    return jnp.take(u, jnp.asarray(hidx), axis=2)


# ----------------------------------------------------------------------------
# Main
# ----------------------------------------------------------------------------

if __name__ == "__main__":
    n_classes = 10
    key = jax.random.PRNGKey(0)
    keys = jax.random.split(key, 13)

    def winit(k, shape, scale=0.1):
        return scale * jax.random.normal(k, shape, jnp.float32)

    def block_params(kw, kb, cin, cout, ksz):
        w = winit(kw, (ksz, ksz, cin, cout))            # HWIO conv weight
        bias = winit(kb, (1, cout))
        gamma = jnp.ones((1, cout), jnp.float32)        # BatchNorm2d default init
        beta = jnp.zeros((1, cout), jnp.float32)
        return (w, bias, gamma, beta)

    params = {
        "conv1": block_params(keys[0], keys[1], 3, 10, 1),
        "conv2": block_params(keys[2], keys[3], 3, 10, 3),
        "conv3": block_params(keys[4], keys[5], 3, 10, 5),
        "pool":  block_params(keys[6], keys[7], 3, 10, 3),
        "linear": (winit(keys[8], (720, 1024), 0.02),
                   winit(keys[9], (1, 1024), 0.02)),
        "fc":     (winit(keys[10], (1024, n_classes), 0.02),
                   winit(keys[11], (1, n_classes), 0.02)),
    }

    # Input consistent with the module: NCHW, 3 input channels, small spatial.
    x = jax.random.normal(keys[12], (2, 3, 8, 8), jnp.float32)

    fwd = jax.jit(inception_forward)
    out = jax.block_until_ready(fwd(x, params))

    assert out.shape == (2, 40, 720, n_classes), out.shape
    assert bool(jnp.all(jnp.isfinite(out)))

    # Validate the fused/folded Pallas path against a plain-XLA reference.
    ref = jax.block_until_ready(jax.jit(reference_forward)(x, params))
    np.testing.assert_allclose(np.asarray(out), np.asarray(ref),
                               rtol=2e-3, atol=2e-3)

    print("KERNEL_OK")
</pallas_src>

<mosaic_0001>
module attributes {stable_mosaic.version = 11 : i64} {
  func.func @_inception_kernel(%arg0: memref<128x128xf32, #tpu.memory_space<vmem>>, %arg1: memref<128x128xf32, #tpu.memory_space<vmem>>, %arg2: memref<1x128xf32, #tpu.memory_space<vmem>>, %arg3: memref<1x128xf32, #tpu.memory_space<vmem>>, %arg4: memref<1x128xf32, #tpu.memory_space<vmem>>, %arg5: memref<256x128xf32, #tpu.memory_space<vmem>>, %arg6: memref<256x1xf32, #tpu.memory_space<vmem>>, %arg7: memref<256x128xf32, #tpu.memory_space<vmem>>) attributes {dimension_semantics = [], scalar_prefetch = 0 : i64, scratch_operands = 0 : i64, tpu.core_type = #tpu.core_type<tc>} {
    %c0 = arith.constant 0 : index
    %c0_0 = arith.constant 0 : index
    %0 = vector.load %arg0[%c0, %c0_0] : memref<128x128xf32, #tpu.memory_space<vmem>>, vector<128x128xf32>
    %c0_1 = arith.constant 0 : index
    %c0_2 = arith.constant 0 : index
    %1 = vector.load %arg1[%c0_1, %c0_2] : memref<128x128xf32, #tpu.memory_space<vmem>>, vector<128x128xf32>
    %cst = arith.constant dense<0.000000e+00> : vector<128x128xf32>
    %2 = tpu.matmul %0, %1, %cst {dimension_numbers = #tpu.dot_dimension_numbers<[1], [0], [0], [1], [0, 0, 1, 1], [], []>} : vector<128x128xf32>, vector<128x128xf32>, vector<128x128xf32> -> vector<128x128xf32>
    %c0_3 = arith.constant 0 : index
    %c0_4 = arith.constant 0 : index
    %3 = vector.load %arg2[%c0_3, %c0_4] : memref<1x128xf32, #tpu.memory_space<vmem>>, vector<1x128xf32>
    %4 = vector.broadcast %3 : vector<1x128xf32> to vector<128x128xf32>
    %5 = arith.addf %2, %4 : vector<128x128xf32>
    %cst_5 = arith.constant dense<0.000000e+00> : vector<128xf32>
    %6 = vector.multi_reduction <add>, %5, %cst_5 [0] : vector<128x128xf32> to vector<128xf32>
    %7 = vector.shape_cast %6 : vector<128xf32> to vector<1x128xf32>
    %cst_6 = arith.constant 1.280000e+02 : f32
    %8 = vector.broadcast %cst_6 : f32 to vector<1x128xf32>
    %9 = arith.divf %7, %8 : vector<1x128xf32>
    %10 = vector.broadcast %9 : vector<1x128xf32> to vector<128x128xf32>
    %11 = arith.subf %5, %10 : vector<128x128xf32>
    %12 = arith.mulf %11, %11 : vector<128x128xf32>
    %cst_7 = arith.constant dense<0.000000e+00> : vector<128xf32>
    %13 = vector.multi_reduction <add>, %12, %cst_7 [0] : vector<128x128xf32> to vector<128xf32>
    %14 = vector.shape_cast %13 : vector<128xf32> to vector<1x128xf32>
    %cst_8 = arith.constant 1.280000e+02 : f32
    %15 = vector.broadcast %cst_8 : f32 to vector<1x128xf32>
    %16 = arith.divf %14, %15 : vector<1x128xf32>
    %17 = vector.broadcast %9 : vector<1x128xf32> to vector<128x128xf32>
    %18 = arith.subf %5, %17 : vector<128x128xf32>
    %cst_9 = arith.constant 9.99999974E-6 : f32
    %19 = vector.broadcast %cst_9 : f32 to vector<1x128xf32>
    %20 = arith.addf %16, %19 : vector<1x128xf32>
    %21 = math.rsqrt %20 : vector<1x128xf32>
    %22 = vector.broadcast %21 : vector<1x128xf32> to vector<128x128xf32>
    %23 = arith.mulf %18, %22 : vector<128x128xf32>
    %c0_10 = arith.constant 0 : index
    %c0_11 = arith.constant 0 : index
    %24 = vector.load %arg3[%c0_10, %c0_11] : memref<1x128xf32, #tpu.memory_space<vmem>>, vector<1x128xf32>
    %25 = vector.broadcast %24 : vector<1x128xf32> to vector<128x128xf32>
    %26 = arith.mulf %23, %25 : vector<128x128xf32>
    %c0_12 = arith.constant 0 : index
    %c0_13 = arith.constant 0 : index
    %27 = vector.load %arg4[%c0_12, %c0_13] : memref<1x128xf32, #tpu.memory_space<vmem>>, vector<1x128xf32>
    %28 = vector.broadcast %27 : vector<1x128xf32> to vector<128x128xf32>
    %29 = arith.addf %26, %28 : vector<128x128xf32>
    %cst_14 = arith.constant 0.000000e+00 : f32
    %30 = vector.broadcast %cst_14 : f32 to vector<128x128xf32>
    %31 = arith.maximumf %29, %30 : vector<128x128xf32>
    %c0_15 = arith.constant 0 : index
    %c0_16 = arith.constant 0 : index
    %32 = vector.load %arg5[%c0_15, %c0_16] : memref<256x128xf32, #tpu.memory_space<vmem>>, vector<256x128xf32>
    %cst_17 = arith.constant dense<0.000000e+00> : vector<256x128xf32>
    %33 = tpu.matmul %32, %31, %cst_17 {dimension_numbers = #tpu.dot_dimension_numbers<[1], [0], [0], [1], [0, 0, 1, 1], [], []>} : vector<256x128xf32>, vector<128x128xf32>, vector<256x128xf32> -> vector<256x128xf32>
    %c0_18 = arith.constant 0 : index
    %c0_19 = arith.constant 0 : index
    %34 = vector.load %arg6[%c0_18, %c0_19] : memref<256x1xf32, #tpu.memory_space<vmem>>, vector<256x1xf32>
    %35 = vector.broadcast %34 : vector<256x1xf32> to vector<256x128xf32>
    %36 = arith.addf %33, %35 : vector<256x128xf32>
    %c0_20 = arith.constant 0 : index
    %c0_21 = arith.constant 0 : index
    %37 = vector.load %arg7[%c0_20, %c0_21] : memref<256x128xf32, #tpu.memory_space<vmem>>, vector<256x128xf32>
    tpu.vector_store %arg7[%c0_20, %c0_21], %36 {strides = array<i32>} : memref<256x128xf32, #tpu.memory_space<vmem>>, vector<256x128xf32>,
    return
  }
}

</mosaic_0001>

<bundles_post_ra>
// kernel: inception_forward.1
= control target key start
LH: loop header
LB: loop body
LE: loop exit
PB: predicated region body
PF: predicated region fallthrough
CT: control target
= control target key end

     0   :  { %s1751_s1 = inlined_call_operand.vmem [shape: f32[128,128], index: 1, kind: input, shape index: {}]   ;;  %s1752_s0 = inlined_call_operand.vmem [shape: f32[128,128], index: 0, kind: input, shape index: {}]   ;;  %s1753_s2 = inlined_call_operand.vmem [shape: f32[1,128], index: 2, kind: input, shape index: {}]   ;;  %s1754_s6 = inlined_call_operand.vmem [shape: f32[256,1], index: 6, kind: input, shape index: {}]   ;;  %s1755_s5 = inlined_call_operand.vmem [shape: f32[256,128], index: 5, kind: input, shape index: {}]   ;;  %s1756_s3 = inlined_call_operand.vmem [shape: f32[1,128], index: 3, kind: input, shape index: {}]   ;;  %s1757_s4 = inlined_call_operand.vmem [shape: f32[1,128], index: 4, kind: input, shape index: {}]   ;;  %s1758_s7 = inlined_call_operand.vmem [shape: f32[256,128], index: 7, kind: output, shape index: {}]  }
   0x1   :  { %v57_v0 = vld [vmem:[%s1751_s1 + $0x78] sm:$0xff]  ;;  %v56_v1 = vld [vmem:[%s1751_s1 + $0x70] sm:$0xff]  ;;  %v55_v2 = vld [vmem:[%s1751_s1 + $0x68] sm:$0xff] }
   0x2   :  { %935 = vmatprep.subr.mxu0 %v57_v0  ;;  %v54_v3 = vld [vmem:[%s1751_s1 + $0x60] sm:$0xff]  ;;  %v53_v5 = vld [vmem:[%s1751_s1 + $0x58] sm:$0xff]  ;;  %v52_v6 = vld [vmem:[%s1751_s1 + $0x50] sm:$0xff] }
   0x3   :  { %936 = vmatpush3.msra.mxu0 %v57_v0  ;;  %v26_v4 = vld [vmem:[%s1752_s0] sm:$0xff]  ;;  %v51_v7 = vld [vmem:[%s1751_s1 + $0x48] sm:$0xff]  ;;  %v49_v9 = vld [vmem:[%s1751_s1 + $0x38] sm:$0xff] }
   0x4   :  { %937 = vmatprep.subr.mxu0 %v56_v1  ;;  %967 = vmatprep.mubr.f32.mxu0 %v26_v4  ;;  %v50_v8 = vld [vmem:[%s1751_s1 + $0x40] sm:$0xff]  ;;  %v48_v10 = vld [vmem:[%s1751_s1 + $0x30] sm:$0xff]  ;;  %v47_v11 = vld [vmem:[%s1751_s1 + $0x28] sm:$0xff]  ;;  %v1108_v4 = vmov 0  }
   0x5   :  { %938 = vmatpush3.msra.mxu0 %v56_v1  ;;  %v46_v12 = vld [vmem:[%s1751_s1 + $0x20] sm:$0xff]  ;;  %v45_v13 = vld [vmem:[%s1751_s1 + $0x18] sm:$0xff]  ;;  %v44_v14 = vld [vmem:[%s1751_s1 + $0x10] sm:$0xff]  ;;  %1105 = vset.pattern.permute.xlu1 %v1108_v4 }
   0x6   :  { %939 = vmatprep.subr.mxu0 %v55_v2  ;;  %v43_v15 = vld [vmem:[%s1751_s1 + $0x8] sm:$0xff]  ;;  %v42_v16 = vld [vmem:[%s1751_s1] sm:$0xff]  ;;  %v28_v18 = vld [vmem:[%s1752_s0 + $0x10] sm:$0xff]  ;;  %1104 = vset.pattern.permute.xlu0 %v1108_v4 }
   0x7   :  { %940 = vmatpush3.msra.mxu0 %v55_v2  ;;  %v27_v17 = vld [vmem:[%s1752_s0 + $0x8] sm:$0xff]  ;;  %v29_v19 = vld [vmem:[%s1752_s0 + $0x18] sm:$0xff]  ;;  %v30_v20 = vld [vmem:[%s1752_s0 + $0x20] sm:$0xff] }
   0x8   :  { %941 = vmatprep.subr.mxu0 %v54_v3  ;;  %v31_v21 = vld [vmem:[%s1752_s0 + $0x28] sm:$0xff]  ;;  %v32_v22 = vld [vmem:[%s1752_s0 + $0x30] sm:$0xff]  ;;  %v33_v23 = vld [vmem:[%s1752_s0 + $0x38] sm:$0xff] }
   0x9   :  { %942 = vmatpush3.msra.mxu0 %v54_v3  ;;  %v34_v24 = vld [vmem:[%s1752_s0 + $0x40] sm:$0xff]  ;;  %v35_v25 = vld [vmem:[%s1752_s0 + $0x48] sm:$0xff]  ;;  %v36_v26 = vld [vmem:[%s1752_s0 + $0x50] sm:$0xff] }
   0xa   :  { %943 = vmatprep.subr.mxu0 %v53_v5  ;;  %v37_v27 = vld [vmem:[%s1752_s0 + $0x58] sm:$0xff]  ;;  %v38_v28 = vld [vmem:[%s1752_s0 + $0x60] sm:$0xff]  ;;  %v39_v29 = vld [vmem:[%s1752_s0 + $0x68] sm:$0xff] }
   0xb   :  { %944 = vmatpush3.msra.mxu0 %v53_v5  ;;  %v40_v30 = vld [vmem:[%s1752_s0 + $0x70] sm:$0xff]  ;;  %v41_v31 = vld [vmem:[%s1752_s0 + $0x78] sm:$0xff]  ;;  %v1248_v33 = vld [vmem:[%s1753_s2] ss:$0 sm:$0xff] }
   0xc   :  { %945 = vmatprep.subr.mxu0 %v52_v6 }
   0xd   :  { %946 = vmatpush3.msra.mxu0 %v52_v6  ;;  %v401_v6 = vld [vmem:[%s1754_s6 + $0x10] sm:$0xff] }
   0xe   :  { %947 = vmatprep.subr.mxu0 %v51_v7  ;;  %443 = vperm.xlu1 %1105, %v401_v6  }
   0xf   :  { %948 = vmatpush3.msra.mxu0 %v51_v7  ;;  %v399_v7 = vld [vmem:[%s1754_s6] sm:$0xff] }
  0x10   :  { %949 = vmatprep.subr.mxu0 %v50_v8  ;;  %433 = vperm.xlu0 %1104, %v399_v7  }
  0x11   :  { %950 = vmatpush3.msra.mxu0 %v50_v8 }
  0x12   :  { %951 = vmatprep.subr.mxu0 %v49_v9 }
  0x13   :  { %952 = vmatpush3.msra.mxu0 %v49_v9 }
  0x14   :  { %953 = vmatprep.subr.mxu0 %v48_v10 }
  0x15   :  { %954 = vmatpush3.msra.mxu0 %v48_v10 }
  0x16   :  { %955 = vmatprep.subr.mxu0 %v47_v11 }
  0x17   :  { %956 = vmatpush3.msra.mxu0 %v47_v11 }
  0x18   :  { %957 = vmatprep.subr.mxu0 %v46_v12 }
  0x19   :  { %958 = vmatpush3.msra.mxu0 %v46_v12 }
  0x1a   :  { %959 = vmatprep.subr.mxu0 %v45_v13 }
  0x1b   :  { %960 = vmatpush3.msra.mxu0 %v45_v13  ;;  %v402_v13 = vld [vmem:[%s1754_s6 + $0x18] sm:$0xff] }
  0x1c   :  { %961 = vmatprep.subr.mxu0 %v44_v14  ;;  %448 = vperm.xlu1 %1105, %v402_v13  }
  0x1d   :  { %962 = vmatpush3.msra.mxu0 %v44_v14  ;;  %v400_v14 = vld [vmem:[%s1754_s6 + $0x8] sm:$0xff] }
  0x1e   :  { %963 = vmatprep.subr.mxu0 %v43_v15  ;;  %438 = vperm.xlu0 %1104, %v400_v14  }
  0x1f   :  { %964 = vmatpush3.msra.mxu0 %v43_v15 }
  0x20   :  { %965 = vmatprep.subr.mxu0 %v42_v16 }
  0x21   :  { %966 = vmatpush3.msra.mxu0 %v42_v16 }
  0x22   :  { %968 = vmatmul.mubr.f32.vlgmr.msra.gmra.mxu0 %v27_v17 }
  0x23   :  { %970 = vmatprep.mubr.f32.mxu0 %v28_v18  ;;  %v367_v18 = vld [vmem:[%s1755_s5] sm:$0xff] }
  0x26   :  { %971 = vmatmul.mubr.f32.gmra.mxu0 %v29_v19  ;;  %v375_v19 = vld [vmem:[%s1755_s5 + $0x40] sm:$0xff] }
  0x27   :  { %973 = vmatprep.mubr.f32.mxu0 %v30_v20  ;;  %1035 = vmatprep.mubr.f32.mxu1 %v375_v19  ;;  %v404_v20 = vld [vmem:[%s1754_s6 + $0x28] sm:$0xff] }
  0x28   :  { %458 = vperm.xlu1 %1105, %v404_v20  }
  0x2a   :  { %974 = vmatmul.mubr.f32.gmra.mxu0 %v31_v21  ;;  %v403_v21 = vld [vmem:[%s1754_s6 + $0x20] sm:$0xff] }
  0x2b   :  { %976 = vmatprep.mubr.f32.mxu0 %v32_v22  ;;  %453 = vperm.xlu0 %1104, %v403_v21  }
  0x2e   :  { %977 = vmatmul.mubr.f32.gmra.mxu0 %v33_v23 }
  0x2f   :  { %979 = vmatprep.mubr.f32.mxu0 %v34_v24 }
  0x32   :  { %980 = vmatmul.mubr.f32.gmra.mxu0 %v35_v25  ;;  %v406_v25 = vld [vmem:[%s1754_s6 + $0x38] sm:$0xff] }
  0x33   :  { %982 = vmatprep.mubr.f32.mxu0 %v36_v26  ;;  %v405_v26 = vld [vmem:[%s1754_s6 + $0x30] sm:$0xff]  ;;  %468 = vperm.xlu1 %1105, %v406_v25  }
  0x34   :  { %463 = vperm.xlu0 %1104, %v405_v26  }
  0x36   :  { %983 = vmatmul.mubr.f32.gmra.mxu0 %v37_v27 }
  0x37   :  { %985 = vmatprep.mubr.f32.mxu0 %v38_v28 }
  0x3a   :  { %986 = vmatmul.mubr.f32.gmra.mxu0 %v39_v29  ;;  %v408_v29 = vld [vmem:[%s1754_s6 + $0x48] sm:$0xff] }
  0x3b   :  { %988 = vmatprep.mubr.f32.mxu0 %v40_v30  ;;  %v407_v30 = vld [vmem:[%s1754_s6 + $0x40] sm:$0xff]  ;;  %478 = vperm.xlu1 %1105, %v408_v29   ;;  %v425_v29 = vld [vmem:[%s1754_s6 + $0xd0] sm:$0xff] }
  0x3c   :  { %473 = vperm.xlu0 %1104, %v407_v30  }
  0x3e   :  { %989 = vmatmul.mubr.f32.gmra.mxu0 %v41_v31 }
  0x3f   :  { %1023 = vmatprep.mubr.f32.mxu0 %v367_v18 }
  0xe2   :  { %v969_v32 = vpop.f32.mrf.mxu0 }
  0xe3   :  { %v1254_v37 = vadd.f32 %v969_v32, %v1248_v33 }
  0xe4   :  { %v131_v34 = vpop.f32.mrf.mxu0 }
  0xe5   :  { %v1251_v35 = vadd.f32 %v1248_v33, %v131_v34  ;;  %v409_v34 = vld [vmem:[%s1754_s6 + $0x50] sm:$0xff] }
  0xe6   :  { %v972_v36 = vpop.f32.mrf.mxu0  ;;  %483 = vperm.xlu0 %1104, %v409_v34  }
  0xe7   :  { %v210_v39 = vadd.f32 %v1254_v37, %v1251_v35  ;;  %v1262_v42 = vadd.f32 %v972_v36, %v1248_v33 }
  0xe8   :  { %v141_v38 = vpop.f32.mrf.mxu0 }
  0xe9   :  { %v1259_v40 = vadd.f32 %v1248_v33, %v141_v38 }
  0xea   :  { %v975_v41 = vpop.f32.mrf.mxu0 }
  0xeb   :  { %v211_v43 = vadd.f32 %v210_v39, %v1259_v40  ;;  %v1270_v48 = vadd.f32 %v975_v41, %v1248_v33  ;;  %v412_v39 = vld [vmem:[%s1754_s6 + $0x68] sm:$0xff] }
  0xec   :  { %v151_v44 = vpop.f32.mrf.mxu0 }
  0xed   :  { %v1266_v45 = vadd.f32 %v1248_v33, %v151_v44  ;;  %v212_v46 = vadd.f32 %v211_v43, %v1262_v42  ;;  %v411_v43 = vld [vmem:[%s1754_s6 + $0x60] sm:$0xff] }
  0xee   :  { %v978_v47 = vpop.f32.mrf.mxu0  ;;  %493 = vperm.xlu0 %1104, %v411_v43  }
  0xef   :  { %v213_v49 = vadd.f32 %v212_v46, %v1266_v45  ;;  %v1278_v54 = vadd.f32 %v978_v47, %v1248_v33  ;;  %v414_v47 = vld [vmem:[%s1754_s6 + $0x78] sm:$0xff] }
  0xf0   :  { %v161_v50 = vpop.f32.mrf.mxu0 }
  0xf1   :  { %v1274_v51 = vadd.f32 %v1248_v33, %v161_v50  ;;  %v214_v52 = vadd.f32 %v213_v49, %v1270_v48  ;;  %v413_v49 = vld [vmem:[%s1754_s6 + $0x70] sm:$0xff] }
  0xf2   :  { %v981_v53 = vpop.f32.mrf.mxu0  ;;  %503 = vperm.xlu0 %1104, %v413_v49  }
  0xf3   :  { %v215_v55 = vadd.f32 %v214_v52, %v1274_v51  ;;  %v1286_v60 = vadd.f32 %v981_v53, %v1248_v33  ;;  %v416_v52 = vld [vmem:[%s1754_s6 + $0x88] sm:$0xff] }
  0xf4   :  { %v171_v56 = vpop.f32.mrf.mxu0 }
  0xf5   :  { %v1282_v57 = vadd.f32 %v1248_v33, %v171_v56  ;;  %v216_v58 = vadd.f32 %v215_v55, %v1278_v54 }
  0xf6   :  { %v984_v59 = vpop.f32.mrf.mxu0 }
  0xf7   :  { %v217_v61 = vadd.f32 %v216_v58, %v1282_v57  ;;  %v1294_v2 = vadd.f32 %v984_v59, %v1248_v33  ;;  %v418_v59 = vld [vmem:[%s1754_s6 + $0x98] sm:$0xff] }
  0xf8   :  { %v181_v62 = vpop.f32.mrf.mxu0 }
  0xf9   :  { %v1290_v63 = vadd.f32 %v1248_v33, %v181_v62  ;;  %v218_v0 = vadd.f32 %v217_v61, %v1286_v60 }
  0xfa   :  { %v987_v1 = vpop.f32.mrf.mxu0 }
  0xfb   :  { %v219_v3 = vadd.f32 %v218_v0, %v1290_v63  ;;  %v1308_v11 = vadd.f32 %v987_v1, %v1248_v33 }
  0xfc   :  { %v191_v5 = vpop.f32.mrf.mxu0 }
  0xfd   :  { %v1304_v8 = vadd.f32 %v1248_v33, %v191_v5  ;;  %v220_v9 = vadd.f32 %v219_v3, %v1294_v2 }
  0xfe   :  { %v990_v10 = vpop.f32.mrf.mxu0 }
  0xff   :  { %v221_v12 = vadd.f32 %v220_v9, %v1304_v8  ;;  %v1334_v22 = vadd.f32 %v990_v10, %v1248_v33 }
 0x100   :  { %v201_v15 = vpop.f32.mrf.mxu0 }
 0x101   :  { %v1318_v16 = vadd.f32 %v1248_v33, %v201_v15  ;;  %v222_v17 = vadd.f32 %v221_v12, %v1308_v11  ;;  %v410_v33 = vld [vmem:[%s1754_s6 + $0x58] sm:$0xff] }
 0x102   :  { %488 = vperm.xlu1 %1105, %v410_v33  }
 0x103   :  { %v223_v23 = vadd.f32 %v222_v17, %v1318_v16 }
 0x105   :  { %v224_v24 = vadd.f32 %v223_v23, %v1334_v22 }
 0x106   :  { %498 = vperm.xlu1 %1105, %v412_v39  }
 0x107   :  { %v225_v27 = vrot.slane %v224_v24, 4 }
 0x109   :  { %v226_v28 = vadd.f32 %v225_v27, %v224_v24 }
 0x10a   :  { %508 = vperm.xlu1 %1105, %v414_v47  }
 0x10b   :  { %v227_v31 = vrot.slane %v226_v28, 2 }
 0x10d   :  { %v228_v32 = vadd.f32 %v227_v31, %v226_v28 }
 0x10e   :  { %518 = vperm.xlu1 %1105, %v416_v52  }
 0x10f   :  { %v229_v36 = vrot.slane %v228_v32, 1 }
 0x111   :  { %v230_v38 = vadd.f32 %v229_v36, %v228_v32  ;;  %v428_v32 = vld [vmem:[%s1754_s6 + $0xe8] sm:$0xff]  ;;  %v427_v36 = vld [vmem:[%s1754_s6 + $0xe0] sm:$0xff] }
 0x112   :  { %528 = vperm.xlu1 %1105, %v418_v59  }
 0x113   :  { %v1359_v41 = vmul.f32 0.0078125, %v230_v38 }
 0x115   :  { %v1366_v44 = vsub.f32 %v1251_v35, %v1359_v41  ;;  %v1370_v46 = vsub.f32 %v1254_v37, %v1359_v41  ;;  %v1380_v50 = vsub.f32 %v1259_v40, %v1359_v41  ;;  %v1391_v53 = vsub.f32 %v1262_v42, %v1359_v41  ;;  %v415_v40 = vld [vmem:[%s1754_s6 + $0x80] sm:$0xff] }
 0x116   :  { %v1398_v55 = vsub.f32 %v1266_v45, %v1359_v41  ;;  %513 = vperm.xlu0 %1104, %v415_v40   ;;  %v1407_v42 = vsub.f32 %v1270_v48, %v1359_v41  ;;  %v417_v45 = vld [vmem:[%s1754_s6 + $0x90] sm:$0xff]  ;;  %v1416_v0 = vsub.f32 %v1274_v51, %v1359_v41  ;;  %v420_v48 = vld [vmem:[%s1754_s6 + $0xa8] sm:$0xff]  ;;  %v1425_v4 = vsub.f32 %v1278_v54, %v1359_v41  ;;  %v419_v51 = vld [vmem:[%s1754_s6 + $0xa0] sm:$0xff] }
 0x117   :  { %v249_v35 = vmul.f32 %v1366_v44, %v1366_v44  ;;  %v250_v37 = vmul.f32 %v1370_v46, %v1370_v46  ;;  %v251_v56 = vmul.f32 %v1380_v50, %v1380_v50  ;;  %v252_v61 = vmul.f32 %v1391_v53, %v1391_v53  ;;  %538 = vperm.xlu1 %1105, %v420_v48   ;;  %v422_v54 = vld [vmem:[%s1754_s6 + $0xb8] sm:$0xff] }
 0x118   :  { %v253_v1 = vmul.f32 %v1398_v55, %v1398_v55  ;;  %v254_v5 = vmul.f32 %v1407_v42, %v1407_v42  ;;  %v1434_v7 = vsub.f32 %v1282_v57, %v1359_v41  ;;  %v255_v9 = vmul.f32 %v1416_v0, %v1416_v0  ;;  %v421_v57 = vld [vmem:[%s1754_s6 + $0xb0] sm:$0xff] }
 0x119   :  { %v265_v58 = vadd.f32 %v250_v37, %v249_v35  ;;  %v1443_v12 = vsub.f32 %v1286_v60, %v1359_v41  ;;  %v256_v13 = vmul.f32 %v1425_v4, %v1425_v4  ;;  %v1452_v15 = vsub.f32 %v1290_v63, %v1359_v41  ;;  %v424_v60 = vld [vmem:[%s1754_s6 + $0xc8] sm:$0xff]  ;;  %v423_v63 = vld [vmem:[%s1754_s6 + $0xc0] sm:$0xff] }
 0x11a   :  { %523 = vperm.xlu0 %1104, %v417_v45   ;;  %v257_v17 = vmul.f32 %v1434_v7, %v1434_v7  ;;  %v244_v19 = vsub.f32 %v1294_v2, %v1359_v41  ;;  %v245_v23 = vsub.f32 %v1304_v8, %v1359_v41  ;;  %v426_v2 = vld [vmem:[%s1754_s6 + $0xd8] sm:$0xff]  ;;  %v246_v26 = vsub.f32 %v1308_v11, %v1359_v41 }
 0x11b   :  { %v266_v62 = vadd.f32 %v265_v58, %v251_v56  ;;  %548 = vperm.xlu1 %1105, %v422_v54   ;;  %v258_v20 = vmul.f32 %v1443_v12, %v1443_v12  ;;  %v259_v24 = vmul.f32 %v1452_v15, %v1452_v15  ;;  %v247_v8 = vsub.f32 %v1318_v16, %v1359_v41  ;;  %v430_v16 = vld [vmem:[%s1754_s6 + $0xf8] sm:$0xff] }
 0x11c   :  { %v260_v27 = vmul.f32 %v244_v19, %v244_v19  ;;  %v261_v30 = vmul.f32 %v245_v23, %v245_v23  ;;  %v248_v11 = vsub.f32 %v1334_v22, %v1359_v41  ;;  %v262_v33 = vmul.f32 %v246_v26, %v246_v26  ;;  %v429_v22 = vld [vmem:[%s1754_s6 + $0xf0] sm:$0xff] }
 0x11d   :  { %v267_v3 = vadd.f32 %v266_v62, %v252_v61  ;;  %v263_v38 = vmul.f32 %v247_v8, %v247_v8  ;;  %v1499_v62 = vld [vmem:[%s1756_s3] ss:$0 sm:$0xff] }
 0x11e   :  { %533 = vperm.xlu0 %1104, %v419_v51   ;;  %v264_v43 = vmul.f32 %v248_v11, %v248_v11 }
 0x11f   :  { %v268_v6 = vadd.f32 %v267_v3, %v253_v1  ;;  %558 = vperm.xlu1 %1105, %v424_v60  }
 0x121   :  { %v269_v10 = vadd.f32 %v268_v6, %v254_v5  ;;  %v1508_v5 = vld [vmem:[%s1757_s4] ss:$0 sm:$0xff] }
 0x122   :  { %543 = vperm.xlu0 %1104, %v421_v57  }
 0x123   :  { %v270_v14 = vadd.f32 %v269_v10, %v255_v9  ;;  %568 = vperm.xlu1 %1105, %v426_v2  }
 0x125   :  { %v271_v18 = vadd.f32 %v270_v14, %v256_v13 }
 0x126   :  { %553 = vperm.xlu0 %1104, %v423_v63  }
 0x127   :  { %v272_v21 = vadd.f32 %v271_v18, %v257_v17  ;;  %578 = vperm.xlu1 %1105, %v428_v32  }
 0x129   :  { %v273_v25 = vadd.f32 %v272_v21, %v258_v20 }
 0x12a   :  { %563 = vperm.xlu0 %1104, %v425_v29  }
 0x12b   :  { %v274_v28 = vadd.f32 %v273_v25, %v259_v24  ;;  %588 = vperm.xlu1 %1105, %v430_v16  }
 0x12d   :  { %v275_v31 = vadd.f32 %v274_v28, %v260_v27 }
 0x12e   :  { %573 = vperm.xlu0 %1104, %v427_v36  }
 0x12f   :  { %v276_v34 = vadd.f32 %v275_v31, %v261_v30 }
 0x131   :  { %v277_v39 = vadd.f32 %v276_v34, %v262_v33 }
 0x132   :  { %583 = vperm.xlu0 %1104, %v429_v22  }
 0x133   :  { %v278_v47 = vadd.f32 %v277_v39, %v263_v38 }
 0x135   :  { %v279_v41 = vadd.f32 %v278_v47, %v264_v43 }
 0x137   :  { %v280_v49 = vrot.slane %v279_v41, 4 }
 0x139   :  { %v281_v35 = vadd.f32 %v280_v49, %v279_v41 }
 0x13b   :  { %v282_v37 = vrot.slane %v281_v35, 2 }
 0x13d   :  { %v283_v52 = vadd.f32 %v282_v37, %v281_v35 }
 0x13f   :  { %v284_v40 = vrot.slane %v283_v52, 1 }
 0x141   :  { %v285_v56 = vadd.f32 %v284_v40, %v283_v52 }
 0x143   :  { %v286_v58 = vmul.f32 0.0078125, %v285_v56 }
 0x145   :  { %v287_v59 = vadd.f32 1e-05, %v286_v58 }
 0x147   :  { %1106 = vrsqrt.f32 %v287_v59 }
 0x154   :  { %v1494_v61 = vpop.eup %1106 }
 0x155   :  { %v303_v45 = vmul.f32 %v1494_v61, %v247_v8  ;;  %v304_v1 = vmul.f32 %v1494_v61, %v248_v11  ;;  %v302_v3 = vmul.f32 %v1494_v61, %v246_v26  ;;  %v301_v48 = vmul.f32 %v1494_v61, %v245_v23 }
 0x156   :  { %v300_v10 = vmul.f32 %v1494_v61, %v244_v19  ;;  %v299_v57 = vmul.f32 %v1494_v61, %v1452_v15  ;;  %v298_v20 = vmul.f32 %v1494_v61, %v1443_v12  ;;  %v297_v23 = vmul.f32 %v1494_v61, %v1434_v7 }
 0x157   :  { %v326_v6 = vmul.f32 %v1499_v62, %v303_v45  ;;  %v327_v51 = vmul.f32 %v1499_v62, %v304_v1  ;;  %v325_v9 = vmul.f32 %v1499_v62, %v302_v3  ;;  %v324_v14 = vmul.f32 %v1499_v62, %v301_v48  ;;  %v368_v1 = vld [vmem:[%s1755_s5 + $0x8] sm:$0xff]  ;;  %v369_v48 = vld [vmem:[%s1755_s5 + $0x10] sm:$0xff] }
 0x158   :  { %v323_v60 = vmul.f32 %v1499_v62, %v300_v10  ;;  %v322_v63 = vmul.f32 %v1499_v62, %v299_v57  ;;  %v321_v25 = vmul.f32 %v1499_v62, %v298_v20  ;;  %v296_v12 = vmul.f32 %v1494_v61, %v1425_v4  ;;  %v376_v3 = vld [vmem:[%s1755_s5 + $0x48] sm:$0xff]  ;;  %v379_v10 = vld [vmem:[%s1755_s5 + $0x60] sm:$0xff]  ;;  %v381_v57 = vld [vmem:[%s1755_s5 + $0x70] sm:$0xff] }
 0x159   :  { %v350_v54 = vadd.f32 %v1508_v5, %v327_v51  ;;  %v349_v13 = vadd.f32 %v1508_v5, %v326_v6  ;;  %v348_v18 = vadd.f32 %v1508_v5, %v325_v9  ;;  %v347_v21 = vadd.f32 %v1508_v5, %v324_v14  ;;  %v370_v6 = vld [vmem:[%s1755_s5 + $0x18] sm:$0xff]  ;;  %v371_v9 = vld [vmem:[%s1755_s5 + $0x20] sm:$0xff]  ;;  %v373_v14 = vld [vmem:[%s1755_s5 + $0x30] sm:$0xff] }
 0x15a   :  { %v346_v24 = vadd.f32 %v1508_v5, %v323_v60  ;;  %v345_v26 = vadd.f32 %v1508_v5, %v322_v63  ;;  %v320_v7 = vmul.f32 %v1499_v62, %v297_v23  ;;  %v295_v27 = vmul.f32 %v1494_v61, %v1416_v0  ;;  %v378_v51 = vld [vmem:[%s1755_s5 + $0x58] sm:$0xff]  ;;  %v383_v60 = vld [vmem:[%s1755_s5 + $0x80] sm:$0xff]  ;;  %v384_v20 = vld [vmem:[%s1755_s5 + $0x88] sm:$0xff] }
 0x15b   :  { %v366_v17 = vmax.f32 %v350_v54, 0.0  ;;  %v365_v19 = vmax.f32 %v349_v13, 0.0  ;;  %v364_v15 = vmax.f32 %v348_v18, 0.0  ;;  %v363_v2 = vmax.f32 %v347_v21, 0.0  ;;  %v372_v54 = vld [vmem:[%s1755_s5 + $0x28] sm:$0xff]  ;;  %v382_v18 = vld [vmem:[%s1755_s5 + $0x78] sm:$0xff] }
 0x15c   :  { %v362_v28 = vmax.f32 %v346_v24, 0.0  ;;  %v344_v29 = vadd.f32 %v1508_v5, %v321_v25  ;;  %v319_v4 = vmul.f32 %v1499_v62, %v296_v12  ;;  %v294_v8 = vmul.f32 %v1494_v61, %v1407_v42  ;;  %v380_v13 = vld [vmem:[%s1755_s5 + $0x68] sm:$0xff]  ;;  %v386_v21 = vld [vmem:[%s1755_s5 + $0x98] sm:$0xff]  ;;  %v387_v63 = vld [vmem:[%s1755_s5 + $0xa0] sm:$0xff] }
 0x15d   :  { %991 = vmatprep.subr.mxu0 %v366_v17  ;;  %1071 = vmatprep.subr.mxu1 %v366_v17  ;;  %v361_v30 = vmax.f32 %v345_v26, 0.0  ;;  %v343_v31 = vadd.f32 %v1508_v5, %v320_v7  ;;  %v318_v0 = vmul.f32 %v1499_v62, %v295_v27  ;;  %v293_v32 = vmul.f32 %v1494_v61, %v1398_v55  ;;  %v388_v23 = vld [vmem:[%s1755_s5 + $0xa8] sm:$0xff]  ;;  %v390_v24 = vld [vmem:[%s1755_s5 + $0xb8] sm:$0xff]  ;;  %v391_v25 = vld [vmem:[%s1755_s5 + $0xc0] sm:$0xff] }
 0x15e   :  { %992 = vmatpush3.msra.mxu0 %v366_v17  ;;  %1087 = vmatpush3.msra.mxu1 %v366_v17  ;;  %v360_v11 = vmax.f32 %v344_v29, 0.0  ;;  %v342_v33 = vadd.f32 %v1508_v5, %v319_v4  ;;  %v317_v42 = vmul.f32 %v1499_v62, %v294_v8  ;;  %v292_v34 = vmul.f32 %v1494_v61, %v1391_v53  ;;  %v374_v17 = vld [vmem:[%s1755_s5 + $0x38] sm:$0xff]  ;;  %v392_v12 = vld [vmem:[%s1755_s5 + $0xc8] sm:$0xff]  ;;  %v395_v7 = vld [vmem:[%s1755_s5 + $0xe0] sm:$0xff]  ;;  %v444_v4 = vpop.permute.xlu1 %443  ;;  %v434_v8 = vpop.permute.xlu0 %433 }
 0x15f   :  { %993 = vmatprep.subr.mxu0 %v365_v19  ;;  %1072 = vmatprep.subr.mxu1 %v365_v19  ;;  %v359_v36 = vmax.f32 %v343_v31, 0.0  ;;  %v341_v38 = vadd.f32 %v1508_v5, %v318_v0  ;;  %v316_v55 = vmul.f32 %v1499_v62, %v293_v32  ;;  %v291_v39 = vmul.f32 %v1494_v61, %v1380_v50  ;;  %v394_v26 = vld [vmem:[%s1755_s5 + $0xd8] sm:$0xff]  ;;  %v396_v27 = vld [vmem:[%s1755_s5 + $0xe8] sm:$0xff] }
 0x160   :  { %994 = vmatpush3.msra.mxu0 %v365_v19  ;;  %1088 = vmatpush3.msra.mxu1 %v365_v19  ;;  %v358_v16 = vmax.f32 %v342_v33, 0.0  ;;  %v340_v43 = vadd.f32 %v1508_v5, %v317_v42  ;;  %v315_v53 = vmul.f32 %v1499_v62, %v292_v34  ;;  %v290_v47 = vmul.f32 %v1494_v61, %v1370_v46  ;;  %v385_v19 = vld [vmem:[%s1755_s5 + $0x90] sm:$0xff]  ;;  %v398_v29 = vld [vmem:[%s1755_s5 + $0xf8] sm:$0xff] }
 0x161   :  { %995 = vmatprep.subr.mxu0 %v364_v15  ;;  %1073 = vmatprep.subr.mxu1 %v364_v15  ;;  %v357_v22 = vmax.f32 %v341_v38, 0.0  ;;  %v339_v41 = vadd.f32 %v1508_v5, %v316_v55  ;;  %v314_v50 = vmul.f32 %v1499_v62, %v291_v39  ;;  %v289_v49 = vmul.f32 %v1494_v61, %v1366_v44 }
 0x162   :  { %996 = vmatpush3.msra.mxu0 %v364_v15  ;;  %1089 = vmatpush3.msra.mxu1 %v364_v15  ;;  %v356_v35 = vmax.f32 %v340_v43, 0.0  ;;  %v338_v37 = vadd.f32 %v1508_v5, %v315_v53  ;;  %v313_v46 = vmul.f32 %v1499_v62, %v290_v47  ;;  %v389_v15 = vld [vmem:[%s1755_s5 + $0xb0] sm:$0xff]  ;;  %v439_v31 = vpop.permute.xlu0 %438 }
 0x163   :  { %997 = vmatprep.subr.mxu0 %v363_v2  ;;  %1074 = vmatprep.subr.mxu1 %v363_v2  ;;  %v355_v52 = vmax.f32 %v339_v41, 0.0  ;;  %v337_v40 = vadd.f32 %v1508_v5, %v314_v50  ;;  %v312_v56 = vmul.f32 %v1499_v62, %v289_v49 }
 0x164   :  { %998 = vmatpush3.msra.mxu0 %v363_v2  ;;  %1090 = vmatpush3.msra.mxu1 %v363_v2  ;;  %v354_v44 = vmax.f32 %v338_v37, 0.0  ;;  %v336_v58 = vadd.f32 %v1508_v5, %v313_v46  ;;  %v393_v2 = vld [vmem:[%s1755_s5 + $0xd0] sm:$0xff] }
 0x165   :  { %999 = vmatprep.subr.mxu0 %v362_v28  ;;  %1075 = vmatprep.subr.mxu1 %v362_v28  ;;  %v353_v59 = vmax.f32 %v337_v40, 0.0  ;;  %v335_v61 = vadd.f32 %v1508_v5, %v312_v56  ;;  %v377_v5 = vld [vmem:[%s1755_s5 + $0x50] sm:$0xff] }
 0x166   :  { %1000 = vmatpush3.msra.mxu0 %v362_v28  ;;  %1091 = vmatpush3.msra.mxu1 %v362_v28  ;;  %v352_v45 = vmax.f32 %v336_v58, 0.0  ;;  %v397_v28 = vld [vmem:[%s1755_s5 + $0xf0] sm:$0xff]  ;;  %v454_v32 = vpop.permute.xlu0 %453 }
 0x167   :  { %1001 = vmatprep.subr.mxu0 %v361_v30  ;;  %1076 = vmatprep.subr.mxu1 %v361_v30  ;;  %v351_v62 = vmax.f32 %v335_v61, 0.0 }
 0x168   :  { %1002 = vmatpush3.msra.mxu0 %v361_v30  ;;  %1092 = vmatpush3.msra.mxu1 %v361_v30  ;;  %v449_v30 = vpop.permute.xlu1 %448 }
 0x169   :  { %1003 = vmatprep.subr.mxu0 %v360_v11  ;;  %1077 = vmatprep.subr.mxu1 %v360_v11 }
 0x16a   :  { %1004 = vmatpush3.msra.mxu0 %v360_v11  ;;  %1093 = vmatpush3.msra.mxu1 %v360_v11  ;;  %v464_v33 = vpop.permute.xlu0 %463 }
 0x16b   :  { %1005 = vmatprep.subr.mxu0 %v359_v36  ;;  %1078 = vmatprep.subr.mxu1 %v359_v36 }
 0x16c   :  { %1006 = vmatpush3.msra.mxu0 %v359_v36  ;;  %1094 = vmatpush3.msra.mxu1 %v359_v36  ;;  %v459_v0 = vpop.permute.xlu1 %458 }
 0x16d   :  { %1007 = vmatprep.subr.mxu0 %v358_v16  ;;  %1079 = vmatprep.subr.mxu1 %v358_v16 }
 0x16e   :  { %1008 = vmatpush3.msra.mxu0 %v358_v16  ;;  %1095 = vmatpush3.msra.mxu1 %v358_v16  ;;  %v474_v34 = vpop.permute.xlu0 %473 }
 0x16f   :  { %1009 = vmatprep.subr.mxu0 %v357_v22  ;;  %1080 = vmatprep.subr.mxu1 %v357_v22 }
 0x170   :  { %1010 = vmatpush3.msra.mxu0 %v357_v22  ;;  %1096 = vmatpush3.msra.mxu1 %v357_v22  ;;  %v469_v11 = vpop.permute.xlu1 %468 }
 0x171   :  { %1011 = vmatprep.subr.mxu0 %v356_v35  ;;  %1081 = vmatprep.subr.mxu1 %v356_v35 }
 0x172   :  { %1012 = vmatpush3.msra.mxu0 %v356_v35  ;;  %1097 = vmatpush3.msra.mxu1 %v356_v35  ;;  %v484_v38 = vpop.permute.xlu0 %483 }
 0x173   :  { %1013 = vmatprep.subr.mxu0 %v355_v52  ;;  %1082 = vmatprep.subr.mxu1 %v355_v52 }
 0x174   :  { %1014 = vmatpush3.msra.mxu0 %v355_v52  ;;  %1098 = vmatpush3.msra.mxu1 %v355_v52  ;;  %v479_v42 = vpop.permute.xlu1 %478 }
 0x175   :  { %1015 = vmatprep.subr.mxu0 %v354_v44  ;;  %1083 = vmatprep.subr.mxu1 %v354_v44 }
 0x176   :  { %1016 = vmatpush3.msra.mxu0 %v354_v44  ;;  %1099 = vmatpush3.msra.mxu1 %v354_v44  ;;  %v494_v39 = vpop.permute.xlu0 %493 }
 0x177   :  { %1017 = vmatprep.subr.mxu0 %v353_v59  ;;  %1084 = vmatprep.subr.mxu1 %v353_v59 }
 0x178   :  { %1018 = vmatpush3.msra.mxu0 %v353_v59  ;;  %1100 = vmatpush3.msra.mxu1 %v353_v59 }
 0x179   :  { %1019 = vmatprep.subr.mxu0 %v352_v45  ;;  %1085 = vmatprep.subr.mxu1 %v352_v45 }
 0x17a   :  { %1020 = vmatpush3.msra.mxu0 %v352_v45  ;;  %1101 = vmatpush3.msra.mxu1 %v352_v45  ;;  %v504_v43 = vpop.permute.xlu0 %503 }
 0x17b   :  { %1021 = vmatprep.subr.mxu0 %v351_v62  ;;  %1086 = vmatprep.subr.mxu1 %v351_v62 }
 0x17c   :  { %1022 = vmatpush3.msra.mxu0 %v351_v62  ;;  %1102 = vmatpush3.msra.mxu1 %v351_v62 }
 0x17d   :  { %1024 = vmatmul.mubr.f32.vlgmr.msra.gmra.mxu0 %v368_v1  ;;  %1036 = vmatmul.mubr.f32.vlgmr.msra.gmra.mxu1 %v376_v3  ;;  %v489_v36 = vpop.permute.xlu1 %488 }
 0x17e   :  { %1026 = vmatprep.mubr.f32.mxu0 %v369_v48  ;;  %1038 = vmatprep.mubr.f32.mxu1 %v377_v5 }
 0x181   :  { %1027 = vmatmul.mubr.f32.gmra.mxu0 %v370_v6  ;;  %1039 = vmatmul.mubr.f32.gmra.mxu1 %v378_v51  ;;  %v499_v55 = vpop.permute.xlu1 %498 }
 0x182   :  { %1029 = vmatprep.mubr.f32.mxu0 %v371_v9  ;;  %1041 = vmatprep.mubr.f32.mxu1 %v379_v10 }
 0x185   :  { %1030 = vmatmul.mubr.f32.gmra.mxu0 %v372_v54  ;;  %1042 = vmatmul.mubr.f32.gmra.mxu1 %v380_v13  ;;  %v509_v16 = vpop.permute.xlu1 %508 }
 0x186   :  { %1032 = vmatprep.mubr.f32.mxu0 %v373_v14  ;;  %1044 = vmatprep.mubr.f32.mxu1 %v381_v57 }
 0x189   :  { %1033 = vmatmul.mubr.f32.gmra.mxu0 %v374_v17  ;;  %1045 = vmatmul.mubr.f32.gmra.mxu1 %v382_v18  ;;  %v519_v22 = vpop.permute.xlu1 %518 }
 0x18a   :  { %1047 = vmatprep.mubr.f32.mxu1 %v383_v60 }
 0x18d   :  { %1048 = vmatmul.mubr.f32.gmra.mxu1 %v384_v20  ;;  %v529_v45 = vpop.permute.xlu1 %528 }
 0x18e   :  { %1050 = vmatprep.mubr.f32.mxu1 %v385_v19 }
 0x191   :  { %1051 = vmatmul.mubr.f32.gmra.mxu1 %v386_v21  ;;  %v514_v37 = vpop.permute.xlu0 %513 }
 0x192   :  { %1053 = vmatprep.mubr.f32.mxu1 %v387_v63  ;;  %v539_v17 = vpop.permute.xlu1 %538 }
 0x195   :  { %1054 = vmatmul.mubr.f32.gmra.mxu1 %v388_v23  ;;  %v524_v5 = vpop.permute.xlu0 %523 }
 0x196   :  { %1056 = vmatprep.mubr.f32.mxu1 %v389_v15 }
 0x199   :  { %1057 = vmatmul.mubr.f32.gmra.mxu1 %v390_v24  ;;  %v534_v23 = vpop.permute.xlu0 %533 }
 0x19a   :  { %1059 = vmatprep.mubr.f32.mxu1 %v391_v25 }
 0x19d   :  { %1060 = vmatmul.mubr.f32.gmra.mxu1 %v392_v12 }
 0x19e   :  { %1062 = vmatprep.mubr.f32.mxu1 %v393_v2  ;;  %v549_v2 = vpop.permute.xlu1 %548 }
 0x1a1   :  { %1063 = vmatmul.mubr.f32.gmra.mxu1 %v394_v26 }
 0x1a2   :  { %1065 = vmatprep.mubr.f32.mxu1 %v395_v7 }
 0x1a5   :  { %1066 = vmatmul.mubr.f32.gmra.mxu1 %v396_v27  ;;  %v544_v27 = vpop.permute.xlu0 %543 }
 0x1a6   :  { %1068 = vmatprep.mubr.f32.mxu1 %v397_v28 }
 0x1a9   :  { %1069 = vmatmul.mubr.f32.gmra.mxu1 %v398_v29 }
 0x23d   :  { %v1025_v53 = vpop.f32.mrf.mxu0  ;;  %v1037_v47 = vpop.f32.mrf.mxu1 }
 0x23e   :  { %v663_v41 = vadd.f32 %v1025_v53, %v439_v31  ;;  %v703_v50 = vadd.f32 %v1037_v47, %v479_v42 }
 0x23f   :  { %v657_v49 = vpop.f32.mrf.mxu0  ;;  %v697_v35 = vpop.f32.mrf.mxu1 }
 0x240   :  { %817 = vst [vmem:[%s1758_s7 + $0x8] sm:$0xff] %v663_v41  ;;  %825 = vst [vmem:[%s1758_s7 + $0x48] sm:$0xff] %v703_v50  ;;  %v658_v46 = vadd.f32 %v657_v49, %v434_v8  ;;  %v698_v52 = vadd.f32 %v697_v35, %v474_v34 }
 0x241   :  { %v1028_v40 = vpop.f32.mrf.mxu0  ;;  %v1040_v56 = vpop.f32.mrf.mxu1 }
 0x242   :  { %816 = vst [vmem:[%s1758_s7] sm:$0xff] %v658_v46  ;;  %824 = vst [vmem:[%s1758_s7 + $0x40] sm:$0xff] %v698_v52  ;;  %v673_v44 = vadd.f32 %v1028_v40, %v449_v30  ;;  %v713_v58 = vadd.f32 %v1040_v56, %v489_v36  ;;  %v559_v30 = vpop.permute.xlu1 %558 }
 0x243   :  { %v667_v59 = vpop.f32.mrf.mxu0  ;;  %v707_v61 = vpop.f32.mrf.mxu1 }
 0x244   :  { %819 = vst [vmem:[%s1758_s7 + $0x18] sm:$0xff] %v673_v44  ;;  %827 = vst [vmem:[%s1758_s7 + $0x58] sm:$0xff] %v713_v58  ;;  %v668_v62 = vadd.f32 %v667_v59, %v444_v4  ;;  %v708_v1 = vadd.f32 %v707_v61, %v484_v38 }
 0x245   :  { %v1031_v3 = vpop.f32.mrf.mxu0  ;;  %v1043_v48 = vpop.f32.mrf.mxu1 }
 0x246   :  { %818 = vst [vmem:[%s1758_s7 + $0x10] sm:$0xff] %v668_v62  ;;  %826 = vst [vmem:[%s1758_s7 + $0x50] sm:$0xff] %v708_v1  ;;  %v683_v6 = vadd.f32 %v1031_v3, %v459_v0  ;;  %v723_v51 = vadd.f32 %v1043_v48, %v499_v55  ;;  %v569_v36 = vpop.permute.xlu1 %568 }
 0x247   :  { %v677_v9 = vpop.f32.mrf.mxu0  ;;  %v717_v10 = vpop.f32.mrf.mxu1 }
 0x248   :  { %821 = vst [vmem:[%s1758_s7 + $0x28] sm:$0xff] %v683_v6  ;;  %829 = vst [vmem:[%s1758_s7 + $0x68] sm:$0xff] %v723_v51  ;;  %v678_v54 = vadd.f32 %v677_v9, %v454_v32  ;;  %v718_v13 = vadd.f32 %v717_v10, %v494_v39  ;;  %v554_v32 = vpop.permute.xlu0 %553 }
 0x249   :  { %v1034_v14 = vpop.f32.mrf.mxu0  ;;  %v1046_v57 = vpop.f32.mrf.mxu1 }
 0x24a   :  { %820 = vst [vmem:[%s1758_s7 + $0x20] sm:$0xff] %v678_v54  ;;  %828 = vst [vmem:[%s1758_s7 + $0x60] sm:$0xff] %v718_v13  ;;  %v693_v18 = vadd.f32 %v1034_v14, %v469_v11  ;;  %v733_v60 = vadd.f32 %v1046_v57, %v509_v16 }
 0x24b   :  { %v687_v20 = vpop.f32.mrf.mxu0  ;;  %v727_v19 = vpop.f32.mrf.mxu1 }
 0x24c   :  { %823 = vst [vmem:[%s1758_s7 + $0x38] sm:$0xff] %v693_v18  ;;  %831 = vst [vmem:[%s1758_s7 + $0x78] sm:$0xff] %v733_v60  ;;  %v688_v21 = vadd.f32 %v687_v20, %v464_v33  ;;  %v728_v63 = vadd.f32 %v727_v19, %v504_v43  ;;  %v564_v39 = vpop.permute.xlu0 %563 }
 0x24d   :  { %v1049_v15 = vpop.f32.mrf.mxu1 }
 0x24e   :  { %822 = vst [vmem:[%s1758_s7 + $0x30] sm:$0xff] %v688_v21  ;;  %830 = vst [vmem:[%s1758_s7 + $0x70] sm:$0xff] %v728_v63  ;;  %v743_v24 = vadd.f32 %v1049_v15, %v519_v22  ;;  %v579_v22 = vpop.permute.xlu1 %578 }
 0x24f   :  { %v737_v25 = vpop.f32.mrf.mxu1 }
 0x250   :  { %833 = vst [vmem:[%s1758_s7 + $0x88] sm:$0xff] %v743_v24  ;;  %v738_v12 = vadd.f32 %v737_v25, %v514_v37  ;;  %v574_v49 = vpop.permute.xlu0 %573 }
 0x251   :  { %v1052_v26 = vpop.f32.mrf.mxu1 }
 0x252   :  { %832 = vst [vmem:[%s1758_s7 + $0x80] sm:$0xff] %v738_v12  ;;  %v753_v7 = vadd.f32 %v1052_v26, %v529_v45  ;;  %v589_v40 = vpop.permute.xlu1 %588 }
 0x253   :  { %v747_v28 = vpop.f32.mrf.mxu1 }
 0x254   :  { %835 = vst [vmem:[%s1758_s7 + $0x98] sm:$0xff] %v753_v7  ;;  %v748_v29 = vadd.f32 %v747_v28, %v524_v5  ;;  %v584_v58 = vpop.permute.xlu0 %583 }
 0x255   :  { %v1055_v4 = vpop.f32.mrf.mxu1 }
 0x256   :  { %834 = vst [vmem:[%s1758_s7 + $0x90] sm:$0xff] %v748_v29  ;;  %v763_v8 = vadd.f32 %v1055_v4, %v539_v17 }
 0x257   :  { %v757_v31 = vpop.f32.mrf.mxu1 }
 0x258   :  { %837 = vst [vmem:[%s1758_s7 + $0xa8] sm:$0xff] %v763_v8  ;;  %v758_v0 = vadd.f32 %v757_v31, %v534_v23 }
 0x259   :  { %v1058_v11 = vpop.f32.mrf.mxu1 }
 0x25a   :  { %836 = vst [vmem:[%s1758_s7 + $0xa0] sm:$0xff] %v758_v0  ;;  %v773_v33 = vadd.f32 %v1058_v11, %v549_v2 }
 0x25b   :  { %v767_v42 = vpop.f32.mrf.mxu1 }
 0x25c   :  { %839 = vst [vmem:[%s1758_s7 + $0xb8] sm:$0xff] %v773_v33  ;;  %v768_v34 = vadd.f32 %v767_v42, %v544_v27 }
 0x25d   :  { %v1061_v38 = vpop.f32.mrf.mxu1 }
 0x25e   :  { %838 = vst [vmem:[%s1758_s7 + $0xb0] sm:$0xff] %v768_v34  ;;  %v783_v55 = vadd.f32 %v1061_v38, %v559_v30 }
 0x25f   :  { %v777_v16 = vpop.f32.mrf.mxu1 }
 0x260   :  { %841 = vst [vmem:[%s1758_s7 + $0xc8] sm:$0xff] %v783_v55  ;;  %v778_v43 = vadd.f32 %v777_v16, %v554_v32 }
 0x261   :  { %v1064_v53 = vpop.f32.mrf.mxu1 }
 0x262   :  { %840 = vst [vmem:[%s1758_s7 + $0xc0] sm:$0xff] %v778_v43  ;;  %v793_v47 = vadd.f32 %v1064_v53, %v569_v36 }
 0x263   :  { %v787_v41 = vpop.f32.mrf.mxu1 }
 0x264   :  { %843 = vst [vmem:[%s1758_s7 + $0xd8] sm:$0xff] %v793_v47  ;;  %v788_v50 = vadd.f32 %v787_v41, %v564_v39 }
 0x265   :  { %v1067_v35 = vpop.f32.mrf.mxu1 }
 0x266   :  { %842 = vst [vmem:[%s1758_s7 + $0xd0] sm:$0xff] %v788_v50  ;;  %v803_v37 = vadd.f32 %v1067_v35, %v579_v22 }
 0x267   :  { %v797_v46 = vpop.f32.mrf.mxu1 }
 0x268   :  { %845 = vst [vmem:[%s1758_s7 + $0xe8] sm:$0xff] %v803_v37  ;;  %v798_v52 = vadd.f32 %v797_v46, %v574_v49 }
 0x269   :  { %v1070_v56 = vpop.f32.mrf.mxu1 }
 0x26a   :  { %844 = vst [vmem:[%s1758_s7 + $0xe0] sm:$0xff] %v798_v52  ;;  %v813_v44 = vadd.f32 %v1070_v56, %v589_v40 }
 0x26b   :  { %v807_v59 = vpop.f32.mrf.mxu1 }
 0x26c   :  { %847 = vst [vmem:[%s1758_s7 + $0xf8] sm:$0xff] %v813_v44  ;;  %v808_v61 = vadd.f32 %v807_v59, %v584_v58 }
 0x26e   :  { %846 = vst [vmem:[%s1758_s7 + $0xf0] sm:$0xff] %v808_v61 }

</bundles_post_ra>
